<compile_context>
chip_gen: v5e
topology: v5e:2x2
jax: 0.10.0
libtpu: 0.0.40
codegen_flags: <defaults>
</compile_context>

<pallas_src>
import functools

import jax
import jax.numpy as jnp
from jax.experimental import pallas as pl
from jax.experimental.pallas import tpu as pltpu


def _relu_kernel(x_ref, o_ref):
    # Whole-tile elementwise ReLU on the VPU. Weak-typed 0 preserves dtype.
    o_ref[...] = jnp.maximum(x_ref[...], 0)


_LANE_WIDTHS = (2048, 1024, 512, 256, 128)


def _choose_lane_width(n: int):
    """Widest lane dim (multiple of 128, up to 2048) dividing n exactly."""
    for w in _LANE_WIDTHS:
        if n % w == 0:
            return w
    return None


@functools.lru_cache(maxsize=None)
def _generation_tuned_params():
    """Returns (target_block_bytes, vmem_limit_bytes or None) for this chip."""
    vmem_bytes = None
    try:
        vmem_bytes = int(pltpu.get_tpu_info().vmem_capacity_bytes)
    except Exception:
        vmem_bytes = None
    kind = ""
    try:
        kind = jax.devices()[0].device_kind.lower()
    except Exception:
        kind = ""

    is_v7 = ("v7" in kind) or (
        vmem_bytes is not None and vmem_bytes <= 80 * 1024 * 1024
    )
    if is_v7:
        # 64 MiB physical VMEM, ~3.2 TB/s HBM: 6 MiB blocks amortise the
        # ~0.35 us per-grid-step overhead; in+out x 2 buffers = 24 MiB needs
        # more than the 32 MiB scoped default, so raise it explicitly.
        return 6 * 1024 * 1024, 40 * 1024 * 1024
    if "v6" in kind:
        # 128 MiB physical VMEM, ~1.4 TB/s HBM.
        return 4 * 1024 * 1024, 24 * 1024 * 1024
    # v5e-class / unknown: 2 MiB x 2 arrays x 2 buffers = 8 MiB fits the
    # 16 MiB default scoped VMEM; conservative and correct everywhere.
    return 2 * 1024 * 1024, None


def _relu_flat_aligned(x_flat, target_block_bytes, vmem_limit, donate):
    """Pallas ReLU over a flat array whose length is a multiple of 128."""
    n = x_flat.shape[0]
    dtype = x_flat.dtype
    itemsize = jnp.dtype(dtype).itemsize

    lanes = _choose_lane_width(n)  # guaranteed not None here
    rows = n // lanes
    x2d = x_flat.reshape(rows, lanes)

    # Rows per block: largest multiple of 64 fitting the byte budget.
    block_rows = max(64, (target_block_bytes // (lanes * itemsize)) // 64 * 64)
    if block_rows >= rows:
        if rows >= 128:
            # Keep >= 2 grid points so both v7x TensorCores get a share of
            # the streaming work (no-op cost on single-TC v5e/v6e).
            half = pl.cdiv(rows, 2)
            block_rows = max(64, ((half + 63) // 64) * 64)
            if block_rows >= rows:
                block_rows = rows
        else:
            # Single block covering the full sublane extent (block dim equal
            # to the array dim is always legal, regardless of divisibility).
            block_rows = rows

    grid = (pl.cdiv(rows, block_rows),)

    out2d = pl.pallas_call(
        _relu_kernel,
        out_shape=jax.ShapeDtypeStruct((rows, lanes), dtype),
        grid_spec=pltpu.PrefetchScalarGridSpec(
            num_scalar_prefetch=0,
            grid=grid,
            in_specs=[pl.BlockSpec((block_rows, lanes), lambda i: (i, 0))],
            out_specs=pl.BlockSpec((block_rows, lanes), lambda i: (i, 0)),
        ),
        compiler_params=pltpu.CompilerParams(
            dimension_semantics=("parallel",),
            vmem_limit_bytes=vmem_limit,
        ),
        cost_estimate=pl.CostEstimate(
            flops=n, transcendentals=0, bytes_accessed=2 * n * itemsize
        ),
        input_output_aliases={0: 0} if donate else {},
    )(x2d)
    return out2d.reshape(n)


def numba_relu(x: jax.Array, *, target_block_bytes=None, donate: bool = False) -> jax.Array:
    """Elementwise ReLU over an arbitrary-shaped array via a Pallas TPU kernel.

    Matches NumbaReLU.forward: out = max(x, 0), same shape/dtype as input.
    Set donate=True only if the caller no longer needs x (in-place alias).
    """
    orig_shape = x.shape
    n = x.size
    if n == 0:
        return x

    if target_block_bytes is None:
        target_block_bytes, vmem_limit = _generation_tuned_params()
    else:
        # Explicit override: give the pipeline (in+out x 2 buffers) headroom.
        need = 4 * target_block_bytes + (4 << 20)
        vmem_limit = min(need, 64 << 20) if need > (16 << 20) else None

    x_flat = x.reshape(-1)

    if n % 128 == 0:
        out_flat = _relu_flat_aligned(x_flat, target_block_bytes, vmem_limit, donate)
        return out_flat.reshape(orig_shape)

    # Ragged numel: kernel on the 128-aligned prefix, plain VPU max on the
    # <128-element tail. Avoids the previous whole-array jnp.pad + trailing
    # slice (which tripled HBM traffic for a purely bandwidth-bound op).
    n_main = (n // 128) * 128
    tail = jnp.maximum(x_flat[n_main:], 0)
    if n_main == 0:
        return tail.reshape(orig_shape)
    main = _relu_flat_aligned(x_flat[:n_main], target_block_bytes, vmem_limit, False)
    return jnp.concatenate([main, tail]).reshape(orig_shape)


if __name__ == "__main__":
    key = jax.random.PRNGKey(0)

    # 1) Typical NCHW activation (numel % 128 == 0 -> zero-copy reshape path).
    x1 = jax.random.normal(key, (2, 4, 16, 16), dtype=jnp.float32)
    out1 = jax.block_until_ready(numba_relu(x1))
    ref1 = jnp.maximum(x1, 0.0)
    assert out1.shape == x1.shape and out1.dtype == x1.dtype
    assert bool(jnp.all(out1 == ref1))

    # 2) Ragged numel with a 128-aligned prefix (kernel) + small tail (VPU).
    x2 = jax.random.normal(jax.random.fold_in(key, 1), (3, 50, 11), dtype=jnp.float32)
    out2 = jax.block_until_ready(numba_relu(x2))
    ref2 = jnp.maximum(x2, 0.0)
    assert out2.shape == x2.shape and out2.dtype == x2.dtype
    assert bool(jnp.all(out2 == ref2))

    # 3) Tiny ragged numel (< 128 elements -> pure fallback path).
    x3 = jax.random.normal(jax.random.fold_in(key, 2), (3, 5, 7), dtype=jnp.float32)
    out3 = jax.block_until_ready(numba_relu(x3))
    ref3 = jnp.maximum(x3, 0.0)
    assert out3.shape == x3.shape and out3.dtype == x3.dtype
    assert bool(jnp.all(out3 == ref3))

    # 4) Multi-block grid with a masked ragged last row-block (small blocks
    #    forced just to exercise the tiling/masking logic at a small shape).
    x4 = jax.random.normal(jax.random.fold_in(key, 3), (2, 4, 40, 100), dtype=jnp.float32)
    out4 = jax.block_until_ready(numba_relu(x4, target_block_bytes=64 * 1024))
    ref4 = jnp.maximum(x4, 0.0)
    assert out4.shape == x4.shape and out4.dtype == x4.dtype
    assert bool(jnp.all(out4 == ref4))

    print("KERNEL_OK")
</pallas_src>

<mosaic_0001>
module attributes {stable_mosaic.version = 11 : i64} {
  func.func @_relu_kernel(%arg0: i32, %arg1: memref<1x2048xf32, #tpu.memory_space<vmem>>, %arg2: memref<1x2048xf32, #tpu.memory_space<vmem>>) attributes {dimension_semantics = [#tpu.dimension_semantics<parallel>], iteration_bounds = array<i64: 1>, scalar_prefetch = 0 : i64, scratch_operands = 0 : i64, tpu.core_type = #tpu.core_type<tc>, window_params = [{transform_indices = @transform_0, window_bounds = array<i64: 1, 2048>}, {transform_indices = @transform_1, window_bounds = array<i64: 1, 2048>}]} {
    %c0 = arith.constant 0 : index
    %c0_0 = arith.constant 0 : index
    %0 = vector.load %arg1[%c0, %c0_0] : memref<1x2048xf32, #tpu.memory_space<vmem>>, vector<1x2048xf32>
    %cst = arith.constant 0.000000e+00 : f32
    %1 = vector.broadcast %cst : f32 to vector<1x2048xf32>
    %2 = arith.maximumf %0, %1 : vector<1x2048xf32>
    %c0_1 = arith.constant 0 : index
    %c0_2 = arith.constant 0 : index
    %3 = vector.load %arg2[%c0_1, %c0_2] : memref<1x2048xf32, #tpu.memory_space<vmem>>, vector<1x2048xf32>
    tpu.vector_store %arg2[%c0_1, %c0_2], %2 {strides = array<i32>} : memref<1x2048xf32, #tpu.memory_space<vmem>>, vector<1x2048xf32>,
    return
  }
  func.func @transform_0(%arg0: i32) -> (i32, i32) {
    %c0_i32 = arith.constant 0 : i32
    %c0_i32_0 = arith.constant 0 : i32
    return %arg0, %c0_i32 : i32, i32
  }
  func.func @transform_1(%arg0: i32) -> (i32, i32) {
    %c0_i32 = arith.constant 0 : i32
    %c0_i32_0 = arith.constant 0 : i32
    return %arg0, %c0_i32 : i32, i32
  }
}

</mosaic_0001>

<bundles_post_ra>
// kernel: tpu_custom_call.1
= control target key start
LH: loop header
LB: loop body
LE: loop exit
PB: predicated region body
PF: predicated region fallthrough
CT: control target
= control target key end

     0   :  { %6 = vsyncpa [#allocation3], 0  ;;  %s118_s0 = inlined_call_operand.hbm [shape: f32[1,2048], index: 0, kind: input, shape index: {}]   ;;  %s119_s1 = inlined_call_operand.hbm [shape: f32[1,2048], index: 1, kind: output, shape index: {}]  }
   0x1   :  { %7 = vsyncpa [#allocation4], 0  ;;  %s13_s8 = sshll.u32 %s118_s0, 4  ;;  %s100_s9 = smov [#allocation2]   ;;  %s14_s8 = int_to_ptr.hbm [resolvable:$true] %s13_s8 }
   0x2   :  { %s15_s10 = sshll.u32 %s100_s9, 4  ;;  %s16_s10 = int_to_ptr.vmem [resolvable:$true] %s15_s10 }
   0x3   :  { %18 = dma.hbm_to_vmem [thread:$0]  %s14_s8, 256, %s16_s10, [#allocation3]  }
   0x4   :  { %96 = dma.done.wait [#allocation3], 256  }
   0x5   :  { %97 = vsyncadd [#allocation3], 4294967040  ;;  %s101_s11 = smov [#allocation5]   ;;  %s36_s15 = sshll.u32 %s119_s1, 4  ;;  %v23_v0 = vld [vmem:[#allocation2] sm:$0xff]  ;;  %v24_v1 = vld [vmem:[#allocation2 + $0x8] sm:$0xff]  ;;  %s37_s15 = int_to_ptr.hbm [resolvable:$true] %s36_s15 }
   0x6   :  { %s34_s12 = sshll.u32 %s101_s11, 4  ;;  %v25_v2 = vmax.f32 %v23_v0, 0.0  ;;  %v26_v3 = vmax.f32 %v24_v1, 0.0  ;;  %s35_s12 = int_to_ptr.vmem [resolvable:$true] %s34_s12 }
   0x8   :  { %27 = vst [vmem:[#allocation5] sm:$0xff] %v25_v2 }
   0x9   :  { %28 = vst [vmem:[#allocation5 + $0x8] sm:$0xff] %v26_v3 }
   0xa   :  { %39 = dma.vmem_to_hbm [thread:$0]  %s35_s12, 256, %s37_s15, [#allocation4]  }
   0xb   :  { %98 = dma.done.wait [#allocation4], 256  }
   0xc   :  { %99 = vsyncadd [#allocation4], 4294967040 }
   0xd   :  { %44 = vsyncpa [#allocation3], 1 }
   0xe   :  { %45 = vsyncpa [#allocation4], 1 }

</bundles_post_ra>
